<compile_context>
chip_gen: v6e
topology: v6e:2x2x1
jax: 0.10.0
libtpu: 0.0.40
codegen_flags: <defaults>
</compile_context>

<pallas_src>
import functools

import jax
import jax.numpy as jnp
from jax.experimental import pallas as pl
from jax.experimental.pallas import tpu as pltpu

GN_EPS = 1e-5   # nn.GroupNorm default eps
WS_EPS = 1e-6   # StdConv3d weight-standardization eps


# ---------------------------------------------------------------------------
# pltpu.roll direction probe (one tiny kernel, run once outside jit).
# Guards the tap-shift construction against any ambiguity in the rotate
# direction across toolchain versions.
# ---------------------------------------------------------------------------
_ROLL_SIGN = None


def _get_roll_sign():
    """+1 if pltpu.roll matches np.roll (out[i] = in[(i - shift) % n]), -1 if
    the direction is reversed.  Must first be called outside jit (primed in
    __main__); afterwards it returns a cached Python int."""
    global _ROLL_SIGN
    if _ROLL_SIGN is None:
        def probe(x_ref, o_ref):
            o_ref[...] = pltpu.roll(x_ref[...], 1, 1)

        x = jnp.arange(8 * 128, dtype=jnp.float32).reshape(8, 128)
        r = pl.pallas_call(
            probe, out_shape=jax.ShapeDtypeStruct((8, 128), jnp.float32))(x)
        first = int(r[0, 0])
        if first == 127:
            _ROLL_SIGN = 1
        elif first == 1:
            _ROLL_SIGN = -1
        else:
            raise RuntimeError(f"unexpected pltpu.roll semantics: {first}")
    return _ROLL_SIGN


# ---------------------------------------------------------------------------
# In-kernel helpers
# ---------------------------------------------------------------------------
def _group_norm_relu(y, gamma, beta, num_groups):
    """GroupNorm (contiguous channel groups, biased variance) + affine + ReLU.

    y: (Cout, S) f32, channels on sublanes / flattened spatial on lanes.
    One lane reduction + one small group-mixing matmul; no per-group loop.
    """
    cout, s = y.shape
    cg = cout // num_groups
    gi = jax.lax.broadcasted_iota(jnp.int32, (cout, cout), 0) // cg
    gj = jax.lax.broadcasted_iota(jnp.int32, (cout, cout), 1) // cg
    mix = (gi == gj).astype(jnp.float32)                       # (Cout, Cout)
    inv_n = 1.0 / (cg * s)
    gsum = jnp.dot(mix, y, preferred_element_type=jnp.float32)
    mean = jnp.sum(gsum, axis=1, keepdims=True) * inv_n        # per-group mean
    cen = y - mean
    gsq = jnp.dot(mix, cen * cen, preferred_element_type=jnp.float32)
    var = jnp.sum(gsq, axis=1, keepdims=True) * inv_n          # biased variance
    yn = cen * jax.lax.rsqrt(var + GN_EPS)
    return jnp.maximum(yn * gamma + beta, 0.0)


def aspp_kernel(x_ref, w0_ref, w3_ref, w4_ref, wt_ref,
                g_br_ref, b_br_ref, g_t_ref, b_t_ref, o_ref, *,
                dims, dilations, inner, out_channels, roll_sign):
    D, H, W = dims
    S = D * H * W
    x = x_ref[0]                                    # (Cin, S) bf16, resident
    cin = x.shape[0]
    ng_inner = inner // 4                           # GroupNorm(num_groups=C//4)
    ng_out = out_channels // 4

    # Output-voxel coordinates along the lane axis (conv boundary masks).
    s_idx = jax.lax.broadcasted_iota(jnp.int32, (1, S), 1)
    zz = s_idx // (H * W)
    yy = (s_idx // W) % H
    xx = s_idx % W

    def conv3x3(br):
        """Dilated 3x3x3 conv = 27 tap matmuls on rolled+masked views of x."""
        dil = dilations[br]
        acc = jnp.zeros((inner, S), jnp.float32)
        for kz in range(3):
            for ky in range(3):
                for kx in range(3):
                    t = kz * 9 + ky * 3 + kx
                    dz, dy, dx = (kz - 1) * dil, (ky - 1) * dil, (kx - 1) * dil
                    delta = dz * H * W + dy * W + dx
                    if delta == 0:
                        shifted = x
                    else:
                        # shifted[:, s] == x[:, (s + delta) % S]
                        shifted = pltpu.roll(x, (-roll_sign * delta) % S, 1)
                    part = jnp.dot(w3_ref[br - 1, t], shifted,
                                   preferred_element_type=jnp.float32)
                    # Zero contributions whose source voxel falls outside the
                    # (zero-padded) volume; mask the small (inner, S) f32
                    # partial (v5e-friendly, less data than masking the input).
                    conds = []
                    if dz < 0:
                        conds.append(zz >= -dz)
                    elif dz > 0:
                        conds.append(zz < D - dz)
                    if dy < 0:
                        conds.append(yy >= -dy)
                    elif dy > 0:
                        conds.append(yy < H - dy)
                    if dx < 0:
                        conds.append(xx >= -dx)
                    elif dx > 0:
                        conds.append(xx < W - dx)
                    if conds:
                        valid = functools.reduce(lambda a, b: a & b, conds)
                        part = jnp.where(valid, part, 0.0)
                    acc = acc + part
        return acc

    # --- branch 0: 1x1x1 conv -> GN -> ReLU, accumulate into the transition --
    y = _group_norm_relu(
        jnp.dot(w0_ref[...], x, preferred_element_type=jnp.float32),
        g_br_ref[0], b_br_ref[0], ng_inner)
    trans = jnp.dot(wt_ref[0], y.astype(jnp.bfloat16),
                    preferred_element_type=jnp.float32)

    # --- branches 1..3: dilated 3x3x3 convs -------------------------------
    for br in (1, 2, 3):
        y = _group_norm_relu(conv3x3(br), g_br_ref[br], b_br_ref[br], ng_inner)
        trans = trans + jnp.dot(wt_ref[br], y.astype(jnp.bfloat16),
                                preferred_element_type=jnp.float32)

    # --- branch 4: AdaptiveAvgPool3d(1) -> 1x1 conv -> GN -> ReLU -> nearest
    #     upsample.  The upsampled field is constant over S, so computing the
    #     branch on the broadcast pooled input gives the identical result. ---
    xmean = jnp.sum(x.astype(jnp.float32), axis=1, keepdims=True) * (1.0 / S)
    xbar = jnp.broadcast_to(xmean, (cin, S)).astype(jnp.bfloat16)
    y = _group_norm_relu(
        jnp.dot(w4_ref[...], xbar, preferred_element_type=jnp.float32),
        g_br_ref[4], b_br_ref[4], ng_inner)
    trans = trans + jnp.dot(wt_ref[4], y.astype(jnp.bfloat16),
                            preferred_element_type=jnp.float32)

    # --- transition GroupNorm + ReLU; lane-dense (Cout, S) store -----------
    out = _group_norm_relu(trans, g_t_ref[...], b_t_ref[...], ng_out)
    o_ref[0] = out.astype(o_ref.dtype)


# ---------------------------------------------------------------------------
# JAX-side plumbing: weight standardization, layout prep, pallas_call wrapper.
# ---------------------------------------------------------------------------
def weight_standardize(w):
    """StdConv3d weight standardization: per-output-channel batch_norm of the
    flattened weight (biased variance over Cin*k^3, eps=1e-6, no affine)."""
    cout = w.shape[0]
    wf = w.reshape(cout, -1)
    mu = jnp.mean(wf, axis=1, keepdims=True)
    var = jnp.var(wf, axis=1, keepdims=True)
    return (wf - mu) / jnp.sqrt(var + WS_EPS)          # (Cout, K)


def aspp_forward(x, params, dilations=(1, 2, 3, 4)):
    """x: (N, C, D, H, W) f32 (NCDHW). Returns (N, out_channels, D, H, W)."""
    N, C, D, H, W = x.shape
    S = D * H * W
    inner = params["aspp0"][0].shape[0]
    out_channels = params["transition"][0].shape[0]
    assert C % 4 == 0 and inner % 4 == 0 and out_channels % 4 == 0, \
        "GroupNorm(num_groups=C//4) needs channel counts divisible by 4"
    assert S % 128 == 0, "D*H*W should be a multiple of 128 for lane-dense tiles"

    # Channels-major flattened activations; bf16 halves the dominant HBM stream.
    x_cm = x.reshape(N, C, S).astype(jnp.bfloat16)

    def std_bf16(w):
        return weight_standardize(w).astype(jnp.bfloat16)

    w0 = std_bf16(params["aspp0"][0])                                # (inner, C)
    w4 = std_bf16(params["avg"][0])                                  # (inner, C)
    # 3x3x3 branch weights regrouped as 27 per-tap (inner, C) matrices.
    w3 = jnp.stack([
        jnp.transpose(std_bf16(params[f"aspp{i}"][0]).reshape(inner, C, 3, 3, 3),
                      (2, 3, 4, 0, 1)).reshape(27, inner, C)
        for i in (1, 2, 3)])                                         # (3,27,inner,C)
    # Transition weight split per concatenated branch: (5, out_ch, inner).
    wt = jnp.transpose(
        std_bf16(params["transition"][0]).reshape(out_channels, 5, inner),
        (1, 0, 2))

    names = ("aspp0", "aspp1", "aspp2", "aspp3", "avg")
    g_br = jnp.stack([params[k][1] for k in names]).reshape(5, inner, 1)
    b_br = jnp.stack([params[k][2] for k in names]).reshape(5, inner, 1)
    g_t = params["transition"][1].reshape(out_channels, 1)
    b_t = params["transition"][2].reshape(out_channels, 1)
    g_br, b_br = g_br.astype(jnp.float32), b_br.astype(jnp.float32)
    g_t, b_t = g_t.astype(jnp.float32), b_t.astype(jnp.float32)

    kernel = functools.partial(
        aspp_kernel, dims=(D, H, W), dilations=tuple(dilations),
        inner=inner, out_channels=out_channels, roll_sign=_get_roll_sign())

    # Advisory cost estimate (conv matmuls dominate).
    flops = (2 * N * S * C * inner * (1 + 3 * 27 + 1)
             + 2 * N * S * (5 * inner) * out_channels)
    bytes_accessed = (x_cm.size * 2
                      + (w0.size + w3.size + w4.size + wt.size) * 2
                      + (g_br.size + b_br.size + g_t.size + b_t.size) * 4
                      + N * out_channels * S * 4)

    out = pl.pallas_call(
        kernel,
        out_shape=jax.ShapeDtypeStruct((N, out_channels, S), jnp.float32),
        grid=(N,),
        in_specs=[
            pl.BlockSpec((1, C, S), lambda n: (n, 0, 0)),                 # x
            pl.BlockSpec((inner, C), lambda n: (0, 0)),                   # w0
            pl.BlockSpec((3, 27, inner, C), lambda n: (0, 0, 0, 0)),      # w1..3
            pl.BlockSpec((inner, C), lambda n: (0, 0)),                   # w4
            pl.BlockSpec((5, out_channels, inner), lambda n: (0, 0, 0)),  # wt
            pl.BlockSpec((5, inner, 1), lambda n: (0, 0, 0)),             # gamma br
            pl.BlockSpec((5, inner, 1), lambda n: (0, 0, 0)),             # beta  br
            pl.BlockSpec((out_channels, 1), lambda n: (0, 0)),            # gamma tr
            pl.BlockSpec((out_channels, 1), lambda n: (0, 0)),            # beta  tr
        ],
        out_specs=pl.BlockSpec((1, out_channels, S), lambda n: (n, 0, 0)),
        compiler_params=pltpu.CompilerParams(
            dimension_semantics=("parallel",)),     # batch over TCs on v7x
        cost_estimate=pl.CostEstimate(
            flops=flops,
            transcendentals=N * (5 * inner + out_channels),
            bytes_accessed=bytes_accessed),
    )(x_cm, w0, w3, w4, wt, g_br, b_br, g_t, b_t)

    return out.reshape(N, out_channels, D, H, W)    # back to NCDHW, pure reshape


# ---------------------------------------------------------------------------
# Deterministic parameter init (synthetic; shapes follow ASPP.__init__)
# ---------------------------------------------------------------------------
def init_params(key, channels, out_channels, ratio=4):
    inner = channels // ratio
    shapes = {
        "aspp0": (inner, channels, 1, 1, 1),
        "aspp1": (inner, channels, 3, 3, 3),
        "aspp2": (inner, channels, 3, 3, 3),
        "aspp3": (inner, channels, 3, 3, 3),
        "avg": (inner, channels, 1, 1, 1),
        "transition": (out_channels, inner * 5, 1, 1, 1),
    }
    params = {}
    for i, (name, shp) in enumerate(shapes.items()):
        kw, kg, kb = jax.random.split(jax.random.fold_in(key, i), 3)
        w = 0.1 * jax.random.normal(kw, shp, jnp.float32)
        gamma = 1.0 + 0.1 * jax.random.normal(kg, (shp[0],), jnp.float32)
        beta = 0.05 * jax.random.normal(kb, (shp[0],), jnp.float32)
        params[name] = (w, gamma, beta)
    return params


# ---------------------------------------------------------------------------
# Pure-JAX reference (lax conv) used as the correctness check.
# ---------------------------------------------------------------------------
def ref_conv_block(x, w, gamma, beta, k, dil):
    w_std = weight_standardize(w).reshape(w.shape)
    p = k // 2 + dil - 1
    y = jax.lax.conv_general_dilated(
        x, w_std, window_strides=(1, 1, 1), padding=[(p, p)] * 3,
        rhs_dilation=(dil, dil, dil),
        dimension_numbers=("NCDHW", "OIDHW", "NCDHW"))
    N, C, D, H, W = y.shape
    G = C // 4
    yg = y.reshape(N, G, 4, D, H, W)
    mu = jnp.mean(yg, axis=(2, 3, 4, 5), keepdims=True)
    var = jnp.var(yg, axis=(2, 3, 4, 5), keepdims=True)
    yn = ((yg - mu) / jnp.sqrt(var + GN_EPS)).reshape(N, C, D, H, W)
    yn = yn * gamma[None, :, None, None, None] + beta[None, :, None, None, None]
    return jnp.maximum(yn, 0.0)


def ref_aspp(x, params, dilations=(1, 2, 3, 4)):
    b0 = ref_conv_block(x, *params["aspp0"], 1, dilations[0])
    b1 = ref_conv_block(x, *params["aspp1"], 3, dilations[1])
    b2 = ref_conv_block(x, *params["aspp2"], 3, dilations[2])
    b3 = ref_conv_block(x, *params["aspp3"], 3, dilations[3])
    pooled = jnp.mean(x, axis=(2, 3, 4), keepdims=True)   # AdaptiveAvgPool3d(1)
    avg = ref_conv_block(pooled, *params["avg"], 1, 1)
    avg = jnp.broadcast_to(avg, (x.shape[0], avg.shape[1]) + x.shape[2:])
    cat = jnp.concatenate([b0, b1, b2, b3, avg], axis=1)
    return ref_conv_block(cat, *params["transition"], 1, dilations[0])


if __name__ == "__main__":
    key = jax.random.PRNGKey(0)
    kx, kp = jax.random.split(key)

    N, C, D, H, W = 2, 16, 8, 8, 8          # inner = 4, S = 512
    out_channels = 16
    x = jax.random.normal(kx, (N, C, D, H, W), jnp.float32)
    params = init_params(kp, C, out_channels)

    _get_roll_sign()                        # prime the roll-direction probe (outside jit)

    out = jax.jit(aspp_forward)(x, params)
    out = jax.block_until_ready(out)
    assert out.shape == (N, out_channels, D, H, W)

    ref = ref_aspp(x, params)
    max_err = float(jnp.max(jnp.abs(out - ref)))
    # bf16 matmul operands vs. the f32 reference -> ~1e-2-level deviations
    assert max_err < 8e-2, f"mismatch vs reference: {max_err}"

    print("KERNEL_OK")
</pallas_src>

<mosaic_0001>
module attributes {stable_mosaic.version = 11 : i64} {
  func.func @probe(%arg0: memref<8x128xf32, #tpu.memory_space<vmem>>, %arg1: memref<8x128xf32, #tpu.memory_space<vmem>>) attributes {dimension_semantics = [], scalar_prefetch = 0 : i64, scratch_operands = 0 : i64, tpu.core_type = #tpu.core_type<tc>} {
    %c0 = arith.constant 0 : index
    %c0_0 = arith.constant 0 : index
    %0 = vector.load %arg0[%c0, %c0_0] : memref<8x128xf32, #tpu.memory_space<vmem>>, vector<8x128xf32>
    %c1_i32 = arith.constant 1 : i32
    %1 = tpu.dynamic_rotate %0 by %c1_i32 dim 1 : vector<8x128xf32>, i32 -> vector<8x128xf32>
    %c0_1 = arith.constant 0 : index
    %c0_2 = arith.constant 0 : index
    %2 = vector.load %arg1[%c0_1, %c0_2] : memref<8x128xf32, #tpu.memory_space<vmem>>, vector<8x128xf32>
    tpu.vector_store %arg1[%c0_1, %c0_2], %1 {strides = array<i32>} : memref<8x128xf32, #tpu.memory_space<vmem>>, vector<8x128xf32>,
    return
  }
}

</mosaic_0001>

<bundles_post_ra>
// kernel: tpu_custom_call.1
= control target key start
LH: loop header
LB: loop body
LE: loop exit
PB: predicated region body
PF: predicated region fallthrough
CT: control target
= control target key end

     0   :  { %6 = vsyncpa [#allocation3], 0  ;;  %s106_s0 = inlined_call_operand.hbm [shape: f32[8,128], index: 0, kind: input, shape index: {}]   ;;  %s107_s1 = inlined_call_operand.hbm [shape: f32[8,128], index: 1, kind: output, shape index: {}]  }
   0x1   :  { %7 = vsyncpa [#allocation4], 0  ;;  %s87_s6 = smov [#allocation2]  }
   0x2   :  { %s14_s7 = sshll.u32 %s87_s6, 4  ;;  %s15_s7 = int_to_ptr.vmem [resolvable:$true] %s14_s7 }
   0x3   :  { %s51_s8 = scalar_lea.vmem %s15_s7, 128  ;;  %p56_p1 = scmp.lt.s32.totalorder %s15_s7, %s15_s7 }
   0x4   :  { %p52_p0 = scmp.ne.s32.totalorder %s15_s7, %s51_s8  ;;  %p57_p2 = scmp.lt.s32.totalorder %s51_s8, %s51_s8 }
   0x6   :  { %p58_p3 = por %p57_p2, %p56_p1 }
   0x8   :  { %p59_p4 = pnand %p58_p3, %p52_p0 }
   0xa   :  { %62 = shalt.err (!%p59_p4)
}
   0xb   :  { %17 = dma.hbm_to_vmem [thread:$0]  %s106_s0, 128, %s15_s7, [#allocation3]  }
   0xc   :  { %83 = dma.done.wait [#allocation3], 128  }
   0xd   :  { %84 = vsyncadd [#allocation3], 4294967168  ;;  %v21_v0 = vld [vmem:[#allocation2] sm:$0xff]  ;;  %s88_s11 = smov 1   ;;  %s89_s12 = smov [#allocation5]  }
   0xe   :  { %22 = vrot.lane.b32.xlu0 %v21_v0, %s88_s11  ;;  %s31_s13 = sshll.u32 %s89_s12, 4  ;;  %s32_s13 = int_to_ptr.vmem [resolvable:$true] %s31_s13 }
   0xf   :  { %s63_s14 = scalar_lea.vmem %s32_s13, 128  ;;  %p68_p6 = scmp.lt.s32.totalorder %s32_s13, %s32_s13 }
  0x10   :  { %p64_p5 = scmp.ne.s32.totalorder %s32_s13, %s63_s14  ;;  %p69_p7 = scmp.lt.s32.totalorder %s63_s14, %s63_s14 }
  0x12   :  { %p70_p8 = por %p69_p7, %p68_p6 }
  0x14   :  { %p71_p9 = pnand %p70_p8, %p64_p5 }
  0x80   :  { %v23_v1 = vpop.permute.xlu0 %22 }
  0x81   :  { %24 = vst [vmem:[#allocation5] sm:$0xff] %v23_v1 }
  0x82   :  { %74 = shalt.err (!%p71_p9)
}
  0x83   :  { %34 = dma.vmem_to_hbm [thread:$0]  %s32_s13, 128, %s107_s1, [#allocation4]  }
  0x84   :  { %85 = dma.done.wait [#allocation4], 128  }
  0x85   :  { %86 = vsyncadd [#allocation4], 4294967168 }
  0x86   :  { %38 = vsyncpa [#allocation3], 1 }
  0x87   :  { %39 = vsyncpa [#allocation4], 1 }

</bundles_post_ra>
